<compile_context>
chip_gen: v5e
topology: v5e:2x2
jax: 0.10.0
libtpu: 0.0.40
codegen_flags: <defaults>
</compile_context>

<pallas_src>
import functools
import numpy as np
import jax
import jax.numpy as jnp
from jax.experimental import pallas as pl
from jax.experimental.pallas import tpu as pltpu


# ---------------- constant matrices (pure shape-dependent glue) ----------------

def _interp_matrix_linear(in_size, out_size):
    """PyTorch F.interpolate(mode='linear', align_corners=False) as a matrix."""
    scale = in_size / out_size
    col = np.arange(out_size, dtype=np.int64)
    src = np.maximum((col.astype(np.float64) + 0.5) * scale - 0.5, 0.0)
    i0 = np.minimum(np.floor(src).astype(np.int64), in_size - 1)
    i1 = np.minimum(i0 + 1, in_size - 1)
    w1 = src - i0
    w0 = 1.0 - w1
    m = np.zeros((in_size, out_size), np.float64)
    m[i0, col] += w0
    m[i1, col] += w1
    return m


def _avgpool_matrix(in_size, k):
    """AvgPool1d(kernel_size=k, stride=k) as a matrix (in_size, in_size // k)."""
    p_out = in_size // k
    m = np.zeros((in_size, p_out), np.float64)
    for j in range(p_out):
        m[j * k:(j + 1) * k, j] = 1.0 / k
    return m


@functools.lru_cache(maxsize=None)
def _pool_interp_matrix(l_out):
    """[avg(2)+interp | avg(3)+interp] applied along the length axis: (l_out, 2*l_out)."""
    a2 = _avgpool_matrix(l_out, 2) @ _interp_matrix_linear(l_out // 2, l_out)
    a3 = _avgpool_matrix(l_out, 3) @ _interp_matrix_linear(l_out // 3, l_out)
    return np.concatenate([a2, a3], axis=1).astype(np.float32)


# ------------------------------- Pallas kernel ---------------------------------

def _fused_kernel(w_ref, x_ref, a_ref, o_ref, *, nb, k, c_out, l_out, fold, cpf):
    # w_ref : (k, c_out, c_in+1)   per-tap weights, BN scale folded in,
    #                              last input channel of tap 0 carries the bias
    # x_ref : (nb, c_in+1, l_pad)  zero-padded input + ones channel
    # a_ref : (l_out, 2*l_out)     [avgpool2+interp | avgpool3+interp]
    # o_ref : (nb, 3, cpf, fold*l_out)  lane-dense, layout == (nb, 3*c_out, l_out)
    for b in range(nb):
        # Conv1d(+bias+BN) as k accumulated MXU matmuls over shifted windows.
        acc = jnp.dot(w_ref[0], x_ref[b, :, 0:l_out],
                      preferred_element_type=jnp.float32)
        for t in range(1, k):
            acc = acc + jnp.dot(w_ref[t], x_ref[b, :, t:t + l_out],
                                preferred_element_type=jnp.float32)
        y = jnp.maximum(acc, 0.0)                                  # ReLU, (c_out, l_out)
        # TODO(synk): nn.Dropout(0.3) is eval-mode identity; training mode would
        # use pltpu.prng_seed / pltpu.prng_random_bits here.
        # Both pooling branches + their linear interpolation in one matmul.
        y23 = jnp.dot(y, a_ref[...], preferred_element_type=jnp.float32)  # (c_out, 2*l_out)
        branches = (y, y23[:, :l_out], y23[:, l_out:])
        for br in range(3):
            for q in range(fold):
                o_ref[b, br, :, q * l_out:(q + 1) * l_out] = (
                    branches[br][q * cpf:(q + 1) * cpf, :])


def main3_forward(x, conv_w, conv_b, gamma, beta, run_mean, run_var, eps=1e-5):
    n, c_in, l = x.shape
    c_out, _, k = conv_w.shape
    pad = 1
    l_out = l + 2 * pad - k + 1
    l_pad = l + 2 * pad
    f32 = jnp.float32

    # Channel-pair folding for a lane-dense, transpose-free output layout:
    # (n, 3, c_out/fold, fold*l_out) is a pure reshape of (n, 3*c_out, l_out).
    fold = 2 if (c_out % 2 == 0 and (2 * l_out) % 128 == 0) else 1
    cpf = c_out // fold

    # Batch chunk per grid step: amortize per-step overhead, but keep the
    # parallel grid length >= 2 when possible so both v7x TensorCores work.
    nb = 1
    for cand in (8, 6, 4, 3, 2):
        if n % cand == 0 and n // cand >= 2:
            nb = cand
            break

    # ---- fold BatchNorm (eval) into the conv: scale into W, shift into a fused bias
    scale = gamma / jnp.sqrt(run_var + eps)
    w_scaled = (conv_w * scale[:, None, None]).astype(f32)            # (c_out, c_in, k)
    bias = ((conv_b - run_mean) * scale + beta).astype(f32)           # (c_out,)

    # per-tap weights (k, c_out, c_in); bias folded as an extra input channel on tap 0
    w_taps = jnp.transpose(w_scaled, (2, 0, 1))
    bias_col = jnp.concatenate(
        [bias[None, :, None], jnp.zeros((k - 1, c_out, 1), f32)], axis=0)
    w_aug = jnp.concatenate([w_taps, bias_col], axis=2)               # (k, c_out, c_in+1)

    # permute output channels so lane-block q of row j holds channel j*fold + q
    perm = np.concatenate([np.arange(q, c_out, fold) for q in range(fold)])
    w_aug = w_aug[:, perm, :]

    # ---- input prologue: zero-pad spatially, append the ones channel (bias carrier)
    x_padded = jnp.pad(x.astype(f32), ((0, 0), (0, 0), (pad, pad)))
    x_aug = jnp.concatenate([x_padded, jnp.ones((n, 1, l_pad), f32)], axis=1)

    a = jnp.asarray(_pool_interp_matrix(l_out))                       # (l_out, 2*l_out)

    flops = n * (2 * c_out * (c_in + 1) * k * l_out + 2 * c_out * l_out * 2 * l_out)
    bytes_accessed = 4 * (x_aug.size + w_aug.size + a.size + n * 3 * c_out * l_out)

    out = pl.pallas_call(
        functools.partial(_fused_kernel, nb=nb, k=k, c_out=c_out,
                          l_out=l_out, fold=fold, cpf=cpf),
        out_shape=jax.ShapeDtypeStruct((n, 3, cpf, fold * l_out), f32),
        grid=(n // nb,),
        in_specs=[
            pl.BlockSpec((k, c_out, c_in + 1), lambda i: (0, 0, 0)),   # weights (resident)
            pl.BlockSpec((nb, c_in + 1, l_pad), lambda i: (i, 0, 0)),  # batch chunk
            pl.BlockSpec((l_out, 2 * l_out), lambda i: (0, 0)),        # pool+interp (resident)
        ],
        out_specs=pl.BlockSpec((nb, 3, cpf, fold * l_out), lambda i: (i, 0, 0, 0)),
        compiler_params=pltpu.CompilerParams(dimension_semantics=("parallel",)),
        cost_estimate=pl.CostEstimate(flops=flops, transcendentals=0,
                                      bytes_accessed=bytes_accessed),
    )(w_aug, x_aug, a)

    # Layout-preserving reshape (no transpose, no extra HBM round trip):
    # torch.cat((x1, x2, x3), dim=1) -> (N, 3*C_out, L_out).
    return out.reshape(n, 3 * c_out, l_out)


# --------------------------- pure-JAX reference check ---------------------------

def _interp_linear_ref(y, out_size):
    n, c, in_size = y.shape
    scale = in_size / out_size
    pos = (jnp.arange(out_size, dtype=jnp.float32) + 0.5) * scale - 0.5
    pos = jnp.maximum(pos, 0.0)
    i0 = jnp.minimum(jnp.floor(pos).astype(jnp.int32), in_size - 1)
    i1 = jnp.minimum(i0 + 1, in_size - 1)
    w1 = pos - i0.astype(jnp.float32)
    w0 = 1.0 - w1
    return y[:, :, i0] * w0 + y[:, :, i1] * w1


def _avgpool_ref(y, k):
    n, c, l = y.shape
    p = l // k
    return y[:, :, :p * k].reshape(n, c, p, k).mean(axis=-1)


def _reference(x, conv_w, conv_b, gamma, beta, run_mean, run_var, eps=1e-5):
    y = jax.lax.conv_general_dilated(
        x, conv_w, window_strides=(1,), padding=[(1, 1)],
        dimension_numbers=('NCH', 'OIH', 'NCH'))
    y = y + conv_b[None, :, None]
    y = (y - run_mean[None, :, None]) / jnp.sqrt(run_var[None, :, None] + eps)
    y = y * gamma[None, :, None] + beta[None, :, None]
    y = jnp.maximum(y, 0.0)
    l_out = y.shape[2]
    y2 = _interp_linear_ref(_avgpool_ref(y, 2), l_out)
    y3 = _interp_linear_ref(_avgpool_ref(y, 3), l_out)
    return jnp.concatenate([y, y2, y3], axis=1)


if __name__ == "__main__":
    key = jax.random.PRNGKey(0)
    k_x, k_w, k_b, k_g, k_be, k_x2 = jax.random.split(key, 6)

    N, C_IN, L = 2, 60, 67          # C_IN fixed at 60 by the module
    C_OUT, K = 30, 6                # L_out = 67 + 2 - 6 + 1 = 64

    x = jax.random.normal(k_x, (N, C_IN, L), jnp.float32)
    bound = 1.0 / np.sqrt(C_IN * K)
    conv_w = jax.random.uniform(k_w, (C_OUT, C_IN, K), jnp.float32, -bound, bound)
    conv_b = jax.random.uniform(k_b, (C_OUT,), jnp.float32, -bound, bound)
    gamma = jax.random.uniform(k_g, (C_OUT,), jnp.float32, 0.5, 1.5)
    beta = jax.random.uniform(k_be, (C_OUT,), jnp.float32, -0.5, 0.5)
    run_mean = jnp.zeros((C_OUT,), jnp.float32)
    run_var = jnp.ones((C_OUT,), jnp.float32)

    fwd = jax.jit(main3_forward)

    # N=2: nb=1, grid=(2,) -> both TensorCores engaged on v7x.
    out = jax.block_until_ready(fwd(x, conv_w, conv_b, gamma, beta, run_mean, run_var))
    ref = _reference(x, conv_w, conv_b, gamma, beta, run_mean, run_var)
    assert out.shape == (N, 3 * C_OUT, L - 3), out.shape
    np.testing.assert_allclose(np.asarray(out), np.asarray(ref), rtol=1e-4, atol=1e-4)

    # Larger batch: exercises the nb=4 chunked path (grid=(2,), still parallel).
    N2 = 8
    x2 = jax.random.normal(k_x2, (N2, C_IN, L), jnp.float32)
    out2 = jax.block_until_ready(fwd(x2, conv_w, conv_b, gamma, beta, run_mean, run_var))
    ref2 = _reference(x2, conv_w, conv_b, gamma, beta, run_mean, run_var)
    assert out2.shape == (N2, 3 * C_OUT, L - 3), out2.shape
    np.testing.assert_allclose(np.asarray(out2), np.asarray(ref2), rtol=1e-4, atol=1e-4)

    print("KERNEL_OK")
</pallas_src>

<mosaic_0001>
module attributes {stable_mosaic.version = 11 : i64} {
  func.func @_fused_kernel(%arg0: i32, %arg1: memref<6x30x61xf32, #tpu.memory_space<vmem>>, %arg2: memref<1x61x69xf32, #tpu.memory_space<vmem>>, %arg3: memref<64x128xf32, #tpu.memory_space<vmem>>, %arg4: memref<1x3x15x128xf32, #tpu.memory_space<vmem>>) attributes {dimension_semantics = [#tpu.dimension_semantics<parallel>], iteration_bounds = array<i64: 2>, scalar_prefetch = 0 : i64, scratch_operands = 0 : i64, tpu.core_type = #tpu.core_type<tc>, window_params = [{pipeline_mode = #tpu.pipeline_mode<synchronous>, transform_indices = @transform_0, window_bounds = array<i64: 6, 30, 61>}, {transform_indices = @transform_1, window_bounds = array<i64: 1, 61, 69>}, {pipeline_mode = #tpu.pipeline_mode<synchronous>, transform_indices = @transform_2, window_bounds = array<i64: 64, 128>}, {transform_indices = @transform_3, window_bounds = array<i64: 1, 3, 15, 128>}]} {
    %c0 = arith.constant 0 : index
    %c0_0 = arith.constant 0 : index
    %c0_1 = arith.constant 0 : index
    %0 = vector.load %arg1[%c0, %c0_0, %c0_1] : memref<6x30x61xf32, #tpu.memory_space<vmem>>, vector<1x30x61xf32>
    %1 = vector.shape_cast %0 : vector<1x30x61xf32> to vector<30x61xf32>
    %c0_2 = arith.constant 0 : index
    %c0_3 = arith.constant 0 : index
    %c0_4 = arith.constant 0 : index
    %2 = vector.load %arg2[%c0_2, %c0_3, %c0_4] : memref<1x61x69xf32, #tpu.memory_space<vmem>>, vector<1x61x64xf32>
    %3 = vector.shape_cast %2 : vector<1x61x64xf32> to vector<61x64xf32>
    %cst = arith.constant dense<0.000000e+00> : vector<30x64xf32>
    %4 = tpu.matmul %1, %3, %cst {dimension_numbers = #tpu.dot_dimension_numbers<[1], [0], [0], [1], [0, 0, 1, 1], [], []>} : vector<30x61xf32>, vector<61x64xf32>, vector<30x64xf32> -> vector<30x64xf32>
    %c1 = arith.constant 1 : index
    %c0_5 = arith.constant 0 : index
    %c0_6 = arith.constant 0 : index
    %5 = vector.load %arg1[%c1, %c0_5, %c0_6] : memref<6x30x61xf32, #tpu.memory_space<vmem>>, vector<1x30x61xf32>
    %6 = vector.shape_cast %5 : vector<1x30x61xf32> to vector<30x61xf32>
    %c0_7 = arith.constant 0 : index
    %c0_8 = arith.constant 0 : index
    %c1_9 = arith.constant 1 : index
    %7 = vector.load %arg2[%c0_7, %c0_8, %c1_9] : memref<1x61x69xf32, #tpu.memory_space<vmem>>, vector<1x61x64xf32>
    %8 = vector.shape_cast %7 : vector<1x61x64xf32> to vector<61x64xf32>
    %cst_10 = arith.constant dense<0.000000e+00> : vector<30x64xf32>
    %9 = tpu.matmul %6, %8, %cst_10 {dimension_numbers = #tpu.dot_dimension_numbers<[1], [0], [0], [1], [0, 0, 1, 1], [], []>} : vector<30x61xf32>, vector<61x64xf32>, vector<30x64xf32> -> vector<30x64xf32>
    %10 = arith.addf %4, %9 : vector<30x64xf32>
    %c2 = arith.constant 2 : index
    %c0_11 = arith.constant 0 : index
    %c0_12 = arith.constant 0 : index
    %11 = vector.load %arg1[%c2, %c0_11, %c0_12] : memref<6x30x61xf32, #tpu.memory_space<vmem>>, vector<1x30x61xf32>
    %12 = vector.shape_cast %11 : vector<1x30x61xf32> to vector<30x61xf32>
    %c0_13 = arith.constant 0 : index
    %c0_14 = arith.constant 0 : index
    %c2_15 = arith.constant 2 : index
    %13 = vector.load %arg2[%c0_13, %c0_14, %c2_15] : memref<1x61x69xf32, #tpu.memory_space<vmem>>, vector<1x61x64xf32>
    %14 = vector.shape_cast %13 : vector<1x61x64xf32> to vector<61x64xf32>
    %cst_16 = arith.constant dense<0.000000e+00> : vector<30x64xf32>
    %15 = tpu.matmul %12, %14, %cst_16 {dimension_numbers = #tpu.dot_dimension_numbers<[1], [0], [0], [1], [0, 0, 1, 1], [], []>} : vector<30x61xf32>, vector<61x64xf32>, vector<30x64xf32> -> vector<30x64xf32>
    %16 = arith.addf %10, %15 : vector<30x64xf32>
    %c3 = arith.constant 3 : index
    %c0_17 = arith.constant 0 : index
    %c0_18 = arith.constant 0 : index
    %17 = vector.load %arg1[%c3, %c0_17, %c0_18] : memref<6x30x61xf32, #tpu.memory_space<vmem>>, vector<1x30x61xf32>
    %18 = vector.shape_cast %17 : vector<1x30x61xf32> to vector<30x61xf32>
    %c0_19 = arith.constant 0 : index
    %c0_20 = arith.constant 0 : index
    %c3_21 = arith.constant 3 : index
    %19 = vector.load %arg2[%c0_19, %c0_20, %c3_21] : memref<1x61x69xf32, #tpu.memory_space<vmem>>, vector<1x61x64xf32>
    %20 = vector.shape_cast %19 : vector<1x61x64xf32> to vector<61x64xf32>
    %cst_22 = arith.constant dense<0.000000e+00> : vector<30x64xf32>
    %21 = tpu.matmul %18, %20, %cst_22 {dimension_numbers = #tpu.dot_dimension_numbers<[1], [0], [0], [1], [0, 0, 1, 1], [], []>} : vector<30x61xf32>, vector<61x64xf32>, vector<30x64xf32> -> vector<30x64xf32>
    %22 = arith.addf %16, %21 : vector<30x64xf32>
    %c4 = arith.constant 4 : index
    %c0_23 = arith.constant 0 : index
    %c0_24 = arith.constant 0 : index
    %23 = vector.load %arg1[%c4, %c0_23, %c0_24] : memref<6x30x61xf32, #tpu.memory_space<vmem>>, vector<1x30x61xf32>
    %24 = vector.shape_cast %23 : vector<1x30x61xf32> to vector<30x61xf32>
    %c0_25 = arith.constant 0 : index
    %c0_26 = arith.constant 0 : index
    %c4_27 = arith.constant 4 : index
    %25 = vector.load %arg2[%c0_25, %c0_26, %c4_27] : memref<1x61x69xf32, #tpu.memory_space<vmem>>, vector<1x61x64xf32>
    %26 = vector.shape_cast %25 : vector<1x61x64xf32> to vector<61x64xf32>
    %cst_28 = arith.constant dense<0.000000e+00> : vector<30x64xf32>
    %27 = tpu.matmul %24, %26, %cst_28 {dimension_numbers = #tpu.dot_dimension_numbers<[1], [0], [0], [1], [0, 0, 1, 1], [], []>} : vector<30x61xf32>, vector<61x64xf32>, vector<30x64xf32> -> vector<30x64xf32>
    %28 = arith.addf %22, %27 : vector<30x64xf32>
    %c5 = arith.constant 5 : index
    %c0_29 = arith.constant 0 : index
    %c0_30 = arith.constant 0 : index
    %29 = vector.load %arg1[%c5, %c0_29, %c0_30] : memref<6x30x61xf32, #tpu.memory_space<vmem>>, vector<1x30x61xf32>
    %30 = vector.shape_cast %29 : vector<1x30x61xf32> to vector<30x61xf32>
    %c0_31 = arith.constant 0 : index
    %c0_32 = arith.constant 0 : index
    %c5_33 = arith.constant 5 : index
    %31 = vector.load %arg2[%c0_31, %c0_32, %c5_33] : memref<1x61x69xf32, #tpu.memory_space<vmem>>, vector<1x61x64xf32>
    %32 = vector.shape_cast %31 : vector<1x61x64xf32> to vector<61x64xf32>
    %cst_34 = arith.constant dense<0.000000e+00> : vector<30x64xf32>
    %33 = tpu.matmul %30, %32, %cst_34 {dimension_numbers = #tpu.dot_dimension_numbers<[1], [0], [0], [1], [0, 0, 1, 1], [], []>} : vector<30x61xf32>, vector<61x64xf32>, vector<30x64xf32> -> vector<30x64xf32>
    %34 = arith.addf %28, %33 : vector<30x64xf32>
    %cst_35 = arith.constant 0.000000e+00 : f32
    %35 = vector.broadcast %cst_35 : f32 to vector<30x64xf32>
    %36 = arith.maximumf %34, %35 : vector<30x64xf32>
    %c0_36 = arith.constant 0 : index
    %c0_37 = arith.constant 0 : index
    %37 = vector.load %arg3[%c0_36, %c0_37] : memref<64x128xf32, #tpu.memory_space<vmem>>, vector<64x128xf32>
    %cst_38 = arith.constant dense<0.000000e+00> : vector<30x128xf32>
    %38 = tpu.matmul %36, %37, %cst_38 {dimension_numbers = #tpu.dot_dimension_numbers<[1], [0], [0], [1], [0, 0, 1, 1], [], []>} : vector<30x64xf32>, vector<64x128xf32>, vector<30x128xf32> -> vector<30x128xf32>
    %39 = vector.extract_strided_slice %38 {offsets = [0, 0], sizes = [30, 64], strides = [1, 1]} : vector<30x128xf32> to vector<30x64xf32>
    %40 = vector.extract_strided_slice %38 {offsets = [0, 64], sizes = [30, 64], strides = [1, 1]} : vector<30x128xf32> to vector<30x64xf32>
    %41 = vector.extract_strided_slice %36 {offsets = [0, 0], sizes = [15, 64], strides = [1, 1]} : vector<30x64xf32> to vector<15x64xf32>
    %c0_39 = arith.constant 0 : index
    %c0_40 = arith.constant 0 : index
    %c0_41 = arith.constant 0 : index
    %c0_42 = arith.constant 0 : index
    %42 = vector.load %arg4[%c0_39, %c0_40, %c0_41, %c0_42] : memref<1x3x15x128xf32, #tpu.memory_space<vmem>>, vector<1x1x15x64xf32>
    %43 = vector.shape_cast %42 : vector<1x1x15x64xf32> to vector<15x64xf32>
    %44 = vector.shape_cast %41 : vector<15x64xf32> to vector<1x1x15x64xf32>
    tpu.vector_store %arg4[%c0_39, %c0_40, %c0_41, %c0_42], %44 {strides = array<i32>} : memref<1x3x15x128xf32, #tpu.memory_space<vmem>>, vector<1x1x15x64xf32>,
    %45 = vector.extract_strided_slice %36 {offsets = [15, 0], sizes = [15, 64], strides = [1, 1]} : vector<30x64xf32> to vector<15x64xf32>
    %c0_43 = arith.constant 0 : index
    %c0_44 = arith.constant 0 : index
    %c0_45 = arith.constant 0 : index
    %c64 = arith.constant 64 : index
    %46 = vector.load %arg4[%c0_43, %c0_44, %c0_45, %c64] : memref<1x3x15x128xf32, #tpu.memory_space<vmem>>, vector<1x1x15x64xf32>
    %47 = vector.shape_cast %46 : vector<1x1x15x64xf32> to vector<15x64xf32>
    %48 = vector.shape_cast %45 : vector<15x64xf32> to vector<1x1x15x64xf32>
    tpu.vector_store %arg4[%c0_43, %c0_44, %c0_45, %c64], %48 {strides = array<i32>} : memref<1x3x15x128xf32, #tpu.memory_space<vmem>>, vector<1x1x15x64xf32>,
    %49 = vector.extract_strided_slice %39 {offsets = [0, 0], sizes = [15, 64], strides = [1, 1]} : vector<30x64xf32> to vector<15x64xf32>
    %c0_46 = arith.constant 0 : index
    %c1_47 = arith.constant 1 : index
    %c0_48 = arith.constant 0 : index
    %c0_49 = arith.constant 0 : index
    %50 = vector.load %arg4[%c0_46, %c1_47, %c0_48, %c0_49] : memref<1x3x15x128xf32, #tpu.memory_space<vmem>>, vector<1x1x15x64xf32>
    %51 = vector.shape_cast %50 : vector<1x1x15x64xf32> to vector<15x64xf32>
    %52 = vector.shape_cast %49 : vector<15x64xf32> to vector<1x1x15x64xf32>
    tpu.vector_store %arg4[%c0_46, %c1_47, %c0_48, %c0_49], %52 {strides = array<i32>} : memref<1x3x15x128xf32, #tpu.memory_space<vmem>>, vector<1x1x15x64xf32>,
    %53 = vector.extract_strided_slice %39 {offsets = [15, 0], sizes = [15, 64], strides = [1, 1]} : vector<30x64xf32> to vector<15x64xf32>
    %c0_50 = arith.constant 0 : index
    %c1_51 = arith.constant 1 : index
    %c0_52 = arith.constant 0 : index
    %c64_53 = arith.constant 64 : index
    %54 = vector.load %arg4[%c0_50, %c1_51, %c0_52, %c64_53] : memref<1x3x15x128xf32, #tpu.memory_space<vmem>>, vector<1x1x15x64xf32>
    %55 = vector.shape_cast %54 : vector<1x1x15x64xf32> to vector<15x64xf32>
    %56 = vector.shape_cast %53 : vector<15x64xf32> to vector<1x1x15x64xf32>
    tpu.vector_store %arg4[%c0_50, %c1_51, %c0_52, %c64_53], %56 {strides = array<i32>} : memref<1x3x15x128xf32, #tpu.memory_space<vmem>>, vector<1x1x15x64xf32>,
    %57 = vector.extract_strided_slice %40 {offsets = [0, 0], sizes = [15, 64], strides = [1, 1]} : vector<30x64xf32> to vector<15x64xf32>
    %c0_54 = arith.constant 0 : index
    %c2_55 = arith.constant 2 : index
    %c0_56 = arith.constant 0 : index
    %c0_57 = arith.constant 0 : index
    %58 = vector.load %arg4[%c0_54, %c2_55, %c0_56, %c0_57] : memref<1x3x15x128xf32, #tpu.memory_space<vmem>>, vector<1x1x15x64xf32>
    %59 = vector.shape_cast %58 : vector<1x1x15x64xf32> to vector<15x64xf32>
    %60 = vector.shape_cast %57 : vector<15x64xf32> to vector<1x1x15x64xf32>
    tpu.vector_store %arg4[%c0_54, %c2_55, %c0_56, %c0_57], %60 {strides = array<i32>} : memref<1x3x15x128xf32, #tpu.memory_space<vmem>>, vector<1x1x15x64xf32>,
    %61 = vector.extract_strided_slice %40 {offsets = [15, 0], sizes = [15, 64], strides = [1, 1]} : vector<30x64xf32> to vector<15x64xf32>
    %c0_58 = arith.constant 0 : index
    %c2_59 = arith.constant 2 : index
    %c0_60 = arith.constant 0 : index
    %c64_61 = arith.constant 64 : index
    %62 = vector.load %arg4[%c0_58, %c2_59, %c0_60, %c64_61] : memref<1x3x15x128xf32, #tpu.memory_space<vmem>>, vector<1x1x15x64xf32>
    %63 = vector.shape_cast %62 : vector<1x1x15x64xf32> to vector<15x64xf32>
    %64 = vector.shape_cast %61 : vector<15x64xf32> to vector<1x1x15x64xf32>
    tpu.vector_store %arg4[%c0_58, %c2_59, %c0_60, %c64_61], %64 {strides = array<i32>} : memref<1x3x15x128xf32, #tpu.memory_space<vmem>>, vector<1x1x15x64xf32>,
    return
  }
  func.func @transform_0(%arg0: i32) -> (i32, i32, i32) {
    %c0_i32 = arith.constant 0 : i32
    %c0_i32_0 = arith.constant 0 : i32
    %c0_i32_1 = arith.constant 0 : i32
    %c0_i32_2 = arith.constant 0 : i32
    return %c0_i32, %c0_i32_0, %c0_i32_1 : i32, i32, i32
  }
  func.func @transform_1(%arg0: i32) -> (i32, i32, i32) {
    %c0_i32 = arith.constant 0 : i32
    %c0_i32_0 = arith.constant 0 : i32
    %c0_i32_1 = arith.constant 0 : i32
    return %arg0, %c0_i32, %c0_i32_0 : i32, i32, i32
  }
  func.func @transform_2(%arg0: i32) -> (i32, i32) {
    %c0_i32 = arith.constant 0 : i32
    %c0_i32_0 = arith.constant 0 : i32
    %c0_i32_1 = arith.constant 0 : i32
    return %c0_i32, %c0_i32_0 : i32, i32
  }
  func.func @transform_3(%arg0: i32) -> (i32, i32, i32, i32) {
    %c0_i32 = arith.constant 0 : i32
    %c0_i32_0 = arith.constant 0 : i32
    %c0_i32_1 = arith.constant 0 : i32
    %c0_i32_2 = arith.constant 0 : i32
    return %arg0, %c0_i32, %c0_i32_0, %c0_i32_1 : i32, i32, i32, i32
  }
}

</mosaic_0001>

<bundles_post_ra>
// kernel: main3_forward.1
= control target key start
LH: loop header
LB: loop body
LE: loop exit
PB: predicated region body
PF: predicated region fallthrough
CT: control target
= control target key end

     0   :  { %s985_s12 = smov 0   ;;  %s1186_s0 = inlined_call_operand.vmem [shape: f32[6,30,61], index: 0, kind: input, shape index: {}]   ;;  %s1187_s1 = inlined_call_operand.vmem [shape: f32[2,61,69], index: 1, kind: input, shape index: {}]   ;;  %s1188_s2 = inlined_call_operand.vmem [shape: f32[64,128], index: 2, kind: input, shape index: {}]   ;;  %s1189_s3 = inlined_call_operand.vmem [shape: f32[2,3,15,128], index: 3, kind: output, shape index: {}]  }
   0x1 LB: > { %s762_s13 = sadd.s32 4294967295, %s957_s12   ;;  %p766_p0 = scmp.ge.s32.totalorder %s957_s12, 1  ;;  %s957_s12 = sphi %s985_s12, %s13_s12  }
   0x2   : > { %p137_p1 = scmp.lt.s32.totalorder %s957_s12, 3 }
   0x4   : > { %p138_p2 = pnand %p766_p0, %p137_p1 }
   0x5   : > { %p161_p3 = scmp.lt.s32.totalorder (!%p138_p2), %s762_s13, 1  ;;  %s959_s18 = smov (!%p138_p2), 127  }
   0x6   : > { %141 = sbr.rel (%p138_p2) target bundleno = 596 (0x254), region = 32  ;;  %s960_s19 = smov (!%p138_p2), 124  }
   0x7   : > { %s961_s20 = smov (!%p138_p2), 126   ;;  %s962_s21 = smov (!%p138_p2), 125  }
   0x8   : > { %s963_s22 = smov (!%p138_p2), 123  }
   0xb   : > { %s1191_s13 = smov (!%p161_p3, %s762_s13), 1  ;;  %vm232_vm0 = vcmask 1044480   ;;  %vm219_vm1 = vcmask 498688   ;;  %v171_v13 = vld [vmem:[%s1186_s0] sm:$0xff]  ;;  %v172_v16 = vld [vmem:[%s1186_s0 + $0x8] sm:$0xff]  ;;  %v173_v24 = vld [vmem:[%s1186_s0 + $0x10] sm:$0xff] }
   0xc   : > { %s836_s14 = sshll.u32 %s1191_s13, 6  ;;  %v174_v32 = vld [vmem:[%s1186_s0 + $0x18] sm:$0x3f]  ;;  %v770_v33 = vld [vmem:[%s1186_s0 + $0x20] sm:$0xff]  ;;  %v772_v34 = vld [vmem:[%s1186_s0 + $0x30] sm:$0xff]  ;;  %s861_s10 = smul.u32 48, %s1191_s13 }
   0xd   : > { %s165_s17 = scalar_lea.vmem %s1187_s1, %s836_s14  ;;  %v771_v43 = vld [vmem:[%s1186_s0 + $0x28] sm:$0xff]  ;;  %v773_v47 = vld [vmem:[%s1186_s0 + $0x38] sm:$0x3f]  ;;  %v802_v54 = vld [vmem:[%s1186_s0 + $0x80] sm:$0xff]  ;;  %vm619_vm2 = vcmask 523264   ;;  %vm662_vm3 = vcmask 522240  }
   0xe   : > { %v182_v0 = vld [vmem:[%s165_s17 + $0x38] sm:$0x1f]  ;;  %v179_v2 = vld [vmem:[%s165_s17 + $0x20] sm:$0xff]  ;;  %v180_v4 = vld [vmem:[%s165_s17 + $0x28] sm:$0xff]  ;;  %s1143_s15 = scalar_lea.vmem %s1189_s3, %s861_s10  ;;  %s964_s13 = smov 64   ;;  %vm673_vm4 = vcmask 1048071  }
   0xf   : > { %v178_v1 = vld [vmem:[%s165_s17 + $0x18] sm:$0xff]  ;;  %210 = vrot.lane.b32.xlu0 %v182_v0, %s959_s18  ;;  %v181_v5 = vld [vmem:[%s165_s17 + $0x30] sm:$0xff]  ;;  %v175_v6 = vld [vmem:[%s165_s17] sm:$0xff]  ;;  %779 = vmatpush.msk.msra.mxu1 %vm232_vm0, %v182_v0  ;;  %vm675_vm5 = vcmask 1048064   ;;  %vm677_vm6 = vcmask 1046016  }
  0x10   : > { %v881_v3 = vpack.i.bf16 %v178_v1, %v179_v2  ;;  %196 = vrot.lane.b32.xlu2 %v175_v6, %s959_s18  ;;  %v176_v7 = vld [vmem:[%s165_s17 + $0x8] sm:$0xff]  ;;  %v177_v8 = vld [vmem:[%s165_s17 + $0x10] sm:$0xff]  ;;  %v876_v9 = vpack.i.bf16 %v180_v4, %v181_v5 }
  0x11   : > { %v886_v10 = vpack.i.bf16 %v176_v7, %v177_v8  ;;  %287 = vmatpush.msra.mxu1 %v181_v5  ;;  %v803_v62 = vld [vmem:[%s1186_s0 + $0x88] sm:$0xff] }
  0x12   : > { %882 = vrot.lane.b32.xlu1 %v881_v3, %s959_s18  ;;  %v785_v5 = vld [vmem:[%s1186_s0 + $0x48] sm:$0xff] }
  0x13   : > { %288 = vmatpush.msra.mxu1 %v180_v4  ;;  %v804_v4 = vld [vmem:[%s1186_s0 + $0x90] sm:$0xff] }
  0x15   : > { %289 = vmatpush.msra.mxu1 %v179_v2  ;;  %v793_v2 = vld [vmem:[%s1186_s0 + $0x60] sm:$0xff] }
  0x17   : > { %877 = vrot.lane.b32.xlu0 %v876_v9, %s959_s18  ;;  %290 = vmatpush.msra.mxu1 %v178_v1 }
  0x18   : > { %476 = vrot.lane.b32.xlu2 %v182_v0, %s960_s19 }
  0x19   : > { %291 = vmatpush.msra.mxu1 %v177_v8  ;;  %v794_v8 = vld [vmem:[%s1186_s0 + $0x68] sm:$0xff] }
  0x1a   : > { %887 = vrot.lane.b32.xlu1 %v886_v10, %s959_s18 }
  0x1b   : > { %292 = vmatpush.msra.mxu1 %v176_v7 }
  0x1d   : > { %293 = vmatpush.msra.mxu1 %v175_v6 }
  0x1e   : > { %780 = vmatmul.msk.f32.vlgmr.msra.gmra.mxu1 %vm219_vm1, %v171_v13  ;;  %v805_v13 = vld [vmem:[%s1186_s0 + $0x98] sm:$0x3f] }
  0x1f   : > { %892 = vrot.lane.b32.xlu0 %v876_v9, %s960_s19 }
  0x20   : > { %902 = vrot.lane.b32.xlu2 %v886_v10, %s960_s19 }
  0x22   : > { %897 = vrot.lane.b32.xlu1 %v881_v3, %s960_s19 }
  0x26   : > { %781 = vmatmul.msk.f32.gmra.mxu1 %vm219_vm1, %v172_v16  ;;  %v786_v16 = vld [vmem:[%s1186_s0 + $0x50] sm:$0xff] }
  0x27   : > { %326 = vrot.lane.b32.xlu0 %v182_v0, %s961_s20 }
  0x28   : > { %401 = vrot.lane.b32.xlu2 %v182_v0, %s962_s21 }
  0x2a   : > { %907 = vrot.lane.b32.xlu1 %v876_v9, %s961_s20 }
  0x2e   : > { %782 = vmatmul.msk.f32.gmra.mxu1 %vm219_vm1, %v173_v24  ;;  %v813_v24 = vld [vmem:[%s1186_s0 + $0xb0] sm:$0xff] }
  0x2f   : > { %462 = vrot.lane.b32.xlu0 %v175_v6, %s960_s19 }
  0x30   : > { %917 = vrot.lane.b32.xlu2 %v881_v3, %s961_s20 }
  0x32   : > { %912 = vrot.lane.b32.xlu1 %v876_v9, %s962_s21 }
  0x36   : > { %783 = vmatmul.msk.f32.gmra.mxu1 %vm219_vm1, %v174_v32  ;;  %v614_v32 = vld [vmem:[%s1188_s2 + $0x18] sm:$0xff] }
  0x37   : > { %922 = vrot.lane.b32.xlu0 %v881_v3, %s962_s21 }
  0x38   : > { %932 = vrot.lane.b32.xlu2 %v886_v10, %s962_s21 }
  0x3a   : > { %927 = vrot.lane.b32.xlu1 %v886_v10, %s961_s20 }
  0x3f   : > { %312 = vrot.lane.b32.xlu0 %v175_v6, %s961_s20 }
  0x40   : > { %551 = vrot.lane.b32.xlu2 %v182_v0, %s963_s22  ;;  %v784_v0 = vld [vmem:[%s1186_s0 + $0x40] sm:$0xff] }
  0x42   : > { %387 = vrot.lane.b32.xlu1 %v175_v6, %s962_s21 }
  0x47   : > { %937 = vrot.lane.b32.xlu0 %v876_v9, %s963_s22 }
  0x48   : > { %947 = vrot.lane.b32.xlu2 %v886_v10, %s963_s22 }
  0x4a   : > { %942 = vrot.lane.b32.xlu1 %v881_v3, %s963_s22 }
  0x4f   : > { %537 = vrot.lane.b32.xlu0 %v175_v6, %s963_s22 }
  0x6a   : > { %v197_v11 = vpop.permute.xlu2 %196 }
  0x72   : > { %v477_v12 = vpop.permute.xlu2 %476 }
  0x7a   : > { %v1004_v14 = vpop.permute.xlu2 %902 }
  0x7b   : > { %v904_v49 = vunpack.i.l.bf16 %v1004_v14  ;;  %v905_v51 = vunpack.i.h.bf16 %v1004_v14 }
  0x81   : > { %v211_v15 = vpop.permute.xlu0 %210 }
  0x82   : > { %774 = vmatpush.msk.msra.mxu0 %vm232_vm0, %v211_v15  ;;  %837 = vmatpush.msk.msra.mxu3 %vm232_vm0, %v211_v15  ;;  %v402_v18 = vpop.permute.xlu2 %401 }
  0x84   : > { %v883_v17 = vpop.permute.xlu1 %882 }
  0x85   : > { %v884_v25 = vunpack.i.l.bf16 %v883_v17  ;;  %v885_v26 = vunpack.i.h.bf16 %v883_v17  ;;  %v795_v17 = vld [vmem:[%s1186_s0 + $0x70] sm:$0xff] }
  0x89   : > { %v878_v19 = vpop.permute.xlu0 %877 }
  0x8a   : > { %v879_v20 = vunpack.i.l.bf16 %v878_v19  ;;  %v1012_v22 = vpop.permute.xlu2 %917  ;;  %v880_v23 = vunpack.i.h.bf16 %v878_v19 }
  0x8b   : > { %v919_v44 = vunpack.i.l.bf16 %v1012_v22  ;;  %v920_v46 = vunpack.i.h.bf16 %v1012_v22  ;;  %v787_v22 = vld [vmem:[%s1186_s0 + $0x58] sm:$0x3f] }
  0x8c   : > { %v888_v21 = vpop.permute.xlu1 %887  ;;  %244 = vmatpush.msra.mxu0 %v879_v20  ;;  %838 = vmatpush.msra.mxu3 %v879_v20  ;;  %v811_v20 = vld [vmem:[%s1186_s0 + $0xa0] sm:$0xff] }
  0x8d   : > { %v889_v28 = vunpack.i.l.bf16 %v888_v21  ;;  %v890_v31 = vunpack.i.h.bf16 %v888_v21  ;;  %v812_v21 = vld [vmem:[%s1186_s0 + $0xa8] sm:$0xff] }
  0x8e   : > { %245 = vmatpush.msra.mxu0 %v880_v23  ;;  %839 = vmatpush.msra.mxu3 %v880_v23  ;;  %v796_v23 = vld [vmem:[%s1186_s0 + $0x78] sm:$0x3f] }
  0x90   : > { %246 = vmatpush.msra.mxu0 %v884_v25  ;;  %840 = vmatpush.msra.mxu3 %v884_v25  ;;  %v814_v25 = vld [vmem:[%s1186_s0 + $0xb8] sm:$0x3f] }
  0x91   : > { %v893_v27 = vpop.permute.xlu0 %892 }
  0x92   : > { %247 = vmatpush.msra.mxu0 %v885_v26  ;;  %841 = vmatpush.msra.mxu3 %v885_v26  ;;  %v1018_v30 = vpop.permute.xlu2 %932  ;;  %v894_v36 = vunpack.i.l.bf16 %v893_v27  ;;  %v895_v39 = vunpack.i.h.bf16 %v893_v27  ;;  %v618_v27 = vld [vmem:[%s1188_s2 + $0x38] sm:$0xff] }
  0x93   : > { %v934_v61 = vunpack.i.l.bf16 %v1018_v30  ;;  %v935_v63 = vunpack.i.h.bf16 %v1018_v30  ;;  %v616_v30 = vld [vmem:[%s1188_s2 + $0x28] sm:$0xff] }
  0x94   : > { %v898_v29 = vpop.permute.xlu1 %897  ;;  %248 = vmatpush.msra.mxu0 %v889_v28  ;;  %842 = vmatpush.msra.mxu3 %v889_v28 }
  0x95   : > { %v899_v42 = vunpack.i.l.bf16 %v898_v29  ;;  %v900_v45 = vunpack.i.h.bf16 %v898_v29  ;;  %v617_v29 = vld [vmem:[%s1188_s2 + $0x30] sm:$0xff] }
  0x96   : > { %249 = vmatpush.msra.mxu0 %v890_v31  ;;  %843 = vmatpush.msra.mxu3 %v890_v31  ;;  %v615_v31 = vld [vmem:[%s1188_s2 + $0x20] sm:$0xff] }
  0x98   : > { %250 = vmatpush.msra.mxu0 %v197_v11  ;;  %844 = vmatpush.msra.mxu3 %v197_v11 }
  0x99   : > { %v327_v35 = vpop.permute.xlu0 %326  ;;  %775 = vmatmul.msk.f32.vlgmr.msra.gmra.mxu0 %vm219_vm1, %v770_v33  ;;  %777 = vmatmul.msk.f32.vlgmr.msra.gmra.mxu3 %vm219_vm1, %v772_v34 }
  0x9a   : > { %797 = vmatpush.msk.msrb.mxu3 %vm232_vm0, %v402_v18  ;;  %806 = vmatpush.msk.msrb.mxu0 %vm232_vm0, %v477_v12  ;;  %v552_v38 = vpop.permute.xlu2 %551 }
  0x9b   : > { %788 = vmatpush.msk.msra.mxu2 %vm232_vm0, %v327_v35  ;;  %845 = vmatpush.msk.msrb.mxu1 %vm232_vm0, %v552_v38  ;;  %v295_v33 = vpop.f32.mrf.mxu1 }
  0x9c   : > { %v908_v37 = vpop.permute.xlu1 %907  ;;  %508 = vmatpush.msrb.mxu0 %v894_v36  ;;  %v613_v36 = vld [vmem:[%s1188_s2 + $0x10] sm:$0xff] }
  0x9d   : > { %v909_v40 = vunpack.i.l.bf16 %v908_v37  ;;  %v910_v41 = vunpack.i.h.bf16 %v908_v37  ;;  %v612_v37 = vld [vmem:[%s1188_s2 + $0x8] sm:$0xff] }
  0x9e   : > { %509 = vmatpush.msrb.mxu0 %v895_v39 }
  0x9f   : > { %358 = vmatpush.msra.mxu2 %v909_v40 }
  0xa0   : > { %510 = vmatpush.msrb.mxu0 %v899_v42 }
  0xa1   : > { %359 = vmatpush.msra.mxu2 %v910_v41  ;;  %v463_v48 = vpop.permute.xlu0 %462  ;;  %776 = vmatmul.msk.f32.gmra.mxu0 %vm219_vm1, %v771_v43 }
  0xa2   : > { %511 = vmatpush.msrb.mxu0 %v900_v45  ;;  %778 = vmatmul.msk.f32.gmra.mxu3 %vm219_vm1, %v773_v47  ;;  %v948_v12 = vpop.permute.xlu2 %947 }
  0xa3   : > { %360 = vmatpush.msra.mxu2 %v919_v44  ;;  %v949_v15 = vunpack.i.l.bf16 %v948_v12  ;;  %v950_v18 = vunpack.i.h.bf16 %v948_v12  ;;  %v298_v39 = vpop.f32.mrf.mxu1 }
  0xa4   : > { %v913_v50 = vpop.permute.xlu1 %912  ;;  %512 = vmatpush.msrb.mxu0 %v904_v49 }
  0xa5   : > { %v914_v52 = vunpack.i.l.bf16 %v913_v50  ;;  %361 = vmatpush.msra.mxu2 %v920_v46  ;;  %v915_v53 = vunpack.i.h.bf16 %v913_v50 }
  0xa6   : > { %513 = vmatpush.msrb.mxu0 %v905_v51 }
  0xa7   : > { %433 = vmatpush.msrb.mxu3 %v914_v52 }
  0xa8   : > { %514 = vmatpush.msrb.mxu0 %v463_v48 }
  0xa9   : > { %434 = vmatpush.msrb.mxu3 %v915_v53  ;;  %v923_v55 = vpop.permute.xlu0 %922  ;;  %807 = vmatmul.msk.f32.vlgmr.msrb.gmra.mxu0 %vm219_vm1, %v802_v54 }
  0xaa   : > { %v924_v56 = vunpack.i.l.bf16 %v923_v55  ;;  %815 = vmatpush.msk.msra.mxu0 %vm232_vm0, %v552_v38  ;;  %v925_v59 = vunpack.i.h.bf16 %v923_v55  ;;  %v611_v38 = vld [vmem:[%s1188_s2] sm:$0xff] }
  0xab   : > { %v301_v42 = vpop.f32.mrf.mxu1 }
  0xac   : > { %v928_v57 = vpop.permute.xlu1 %927  ;;  %435 = vmatpush.msrb.mxu3 %v924_v56 }
  0xad   : > { %v929_v58 = vunpack.i.l.bf16 %v928_v57  ;;  %v930_v60 = vunpack.i.h.bf16 %v928_v57 }
  0xae   : > { %436 = vmatpush.msrb.mxu3 %v925_v59 }
  0xaf   : > { %362 = vmatpush.msra.mxu2 %v929_v58 }
  0xb0   : > { %437 = vmatpush.msrb.mxu3 %v934_v61 }
  0xb1   : > { %363 = vmatpush.msra.mxu2 %v930_v60  ;;  %v313_v1 = vpop.permute.xlu0 %312  ;;  %808 = vmatmul.msk.f32.gmra.mxu0 %vm219_vm1, %v803_v62 }
  0xb2   : > { %438 = vmatpush.msrb.mxu3 %v935_v63 }
  0xb3   : > { %364 = vmatpush.msra.mxu2 %v313_v1  ;;  %v304_v51 = vpop.f32.mrf.mxu1 }
  0xb4   : > { %v388_v3 = vpop.permute.xlu1 %387  ;;  %789 = vmatmul.msk.f32.vlgmr.msra.gmra.mxu2 %vm219_vm1, %v784_v0 }
  0xb5   : > { %439 = vmatpush.msrb.mxu3 %v388_v3  ;;  %640 = vmatpush.msrb.mxu2 %v618_v27 }
  0xb6   : > { %798 = vmatmul.msk.f32.vlgmr.msrb.gmra.mxu3 %vm219_vm1, %v793_v2 }
  0xb7   : > { %853 = vmatpush.msra.mxu3 %v618_v27  ;;  %641 = vmatpush.msrb.mxu2 %v617_v29 }
  0xb9   : > { %v938_v6 = vpop.permute.xlu0 %937  ;;  %809 = vmatmul.msk.f32.gmra.mxu0 %vm219_vm1, %v804_v4  ;;  %854 = vmatpush.msra.mxu3 %v617_v29 }
  0xba   : > { %v939_v7 = vunpack.i.l.bf16 %v938_v6  ;;  %v940_v10 = vunpack.i.h.bf16 %v938_v6  ;;  %642 = vmatpush.msrb.mxu2 %v616_v30 }
  0xbb   : > { %855 = vmatpush.msra.mxu3 %v616_v30 }
  0xbc   : > { %790 = vmatmul.msk.f32.gmra.mxu2 %vm219_vm1, %v785_v5  ;;  %v943_v9 = vpop.permute.xlu1 %942  ;;  %583 = vmatpush.msra.mxu0 %v939_v7 }
  0xbd   : > { %846 = vmatpush.msrb.mxu1 %v939_v7  ;;  %v944_v11 = vunpack.i.l.bf16 %v943_v9  ;;  %v945_v14 = vunpack.i.h.bf16 %v943_v9  ;;  %643 = vmatpush.msrb.mxu2 %v615_v31 }
  0xbe   : > { %799 = vmatmul.msk.f32.gmra.mxu3 %vm219_vm1, %v794_v8  ;;  %584 = vmatpush.msra.mxu0 %v940_v10 }
  0xbf   : > { %847 = vmatpush.msrb.mxu1 %v940_v10  ;;  %856 = vmatpush.msra.mxu3 %v615_v31 }
  0xc0   : > { %585 = vmatpush.msra.mxu0 %v944_v11  ;;  %644 = vmatpush.msrb.mxu2 %v614_v32 }
  0xc1   : > { %848 = vmatpush.msrb.mxu1 %v944_v11  ;;  %810 = vmatmul.msk.f32.gmra.mxu0 %vm219_vm1, %v805_v13  ;;  %v538_v19 = vpop.permute.xlu0 %537 }
  0xc2   : > { %586 = vmatpush.msra.mxu0 %v945_v14  ;;  %857 = vmatpush.msra.mxu3 %v614_v32 }
  0xc3   : > { %849 = vmatpush.msrb.mxu1 %v945_v14  ;;  %645 = vmatpush.msrb.mxu2 %v613_v36 }
  0xc4   : > { %791 = vmatmul.msk.f32.gmra.mxu2 %vm219_vm1, %v786_v16  ;;  %587 = vmatpush.msra.mxu0 %v949_v15 }
  0xc5   : > { %850 = vmatpush.msrb.mxu1 %v949_v15  ;;  %858 = vmatpush.msra.mxu3 %v613_v36 }
  0xc6   : > { %800 = vmatmul.msk.f32.gmra.mxu3 %vm219_vm1, %v795_v17  ;;  %588 = vmatpush.msra.mxu0 %v950_v18 }
  0xc7   : > { %851 = vmatpush.msrb.mxu1 %v950_v18  ;;  %646 = vmatpush.msrb.mxu2 %v612_v37 }
  0xc8   : > { %589 = vmatpush.msra.mxu0 %v538_v19  ;;  %859 = vmatpush.msra.mxu3 %v612_v37 }
  0xc9   : > { %852 = vmatpush.msrb.mxu1 %v538_v19  ;;  %816 = vmatmul.msk.f32.vlgmr.msra.gmra.mxu0 %vm219_vm1, %v811_v20 }
  0xca   : > { %817 = vmatmul.msk.f32.vlgmr.msrb.gmra.mxu1 %vm219_vm1, %v812_v21  ;;  %647 = vmatpush.msrb.mxu2 %v611_v38 }
  0xcb   : > { %860 = vmatpush.msra.mxu3 %v611_v38 }
  0xcc   : > { %792 = vmatmul.msk.f32.gmra.mxu2 %vm219_vm1, %v787_v22 }
  0xce   : > { %801 = vmatmul.msk.f32.gmra.mxu3 %vm219_vm1, %v796_v23 }
  0xd2   : > { %818 = vmatmul.msk.f32.gmra.mxu1 %vm219_vm1, %v813_v24 }
  0xda   : > { %819 = vmatmul.msk.f32.gmra.mxu1 %vm219_vm1, %v814_v25 }
 0x116   : > { %v252_v26 = vpop.f32.mrf.mxu0 }
 0x117   : > { %v296_v46 = vadd.f32 %v295_v33, %v252_v26 }
 0x11c   : > { %v258_v34 = vpop.f32.mrf.mxu3 }
 0x11d   : > { %v302_v56 = vadd.f32 %v301_v42, %v258_v34 }
 0x11e   : > { %v255_v28 = vpop.f32.mrf.mxu0 }
 0x11f   : > { %v299_v47 = vadd.f32 %v298_v39, %v255_v28 }
 0x125   : > { %v261_v41 = vpop.f32.mrf.mxu3 }
 0x126   : > { %v516_v35 = vpop.f32.mrf.mxu0  ;;  %v305_v5 = vadd.f32 %v304_v51, %v261_v41 }
 0x12e   : > { %v519_v40 = vpop.f32.mrf.mxu0 }
 0x136   : > { %v522_v44 = vpop.f32.mrf.mxu0 }
 0x137   : > { %v366_v43 = vpop.f32.mrf.mxu2 }
 0x138   : > { %v378_v48 = vadd.f32 %v366_v43, %v296_v46 }
 0x139   : > { %v441_v45 = vpop.f32.mrf.mxu3 }
 0x13a   : > { %v453_v54 = vadd.f32 %v441_v45, %v378_v48 }
 0x13c   : > { %v528_v57 = vadd.f32 %v516_v35, %v453_v54 }
 0x13e   : > { %v525_v50 = vpop.f32.mrf.mxu0 }
 0x13f   : > { %v369_v49 = vpop.f32.mrf.mxu2 }
 0x140   : > { %v379_v52 = vadd.f32 %v369_v49, %v299_v47 }
 0x141   : > { %v444_v53 = vpop.f32.mrf.mxu3 }
 0x142   : > { %v454_v55 = vadd.f32 %v444_v53, %v379_v52 }
 0x144   : > { %v529_v60 = vadd.f32 %v519_v40, %v454_v55 }
 0x146   : > { %v591_v59 = vpop.f32.mrf.mxu0 }
 0x147   : > { %v372_v58 = vpop.f32.mrf.mxu2  ;;  %v603_v62 = vadd.f32 %v591_v59, %v528_v57  ;;  %v594_v63 = vpop.f32.mrf.mxu1 }
 0x148   : > { %v380_v61 = vadd.f32 %v372_v58, %v302_v56  ;;  %v604_v0 = vadd.f32 %v594_v63, %v529_v60 }
 0x149   : > { %v447_v1 = vpop.f32.mrf.mxu3  ;;  %v607_v2 = vmax.f32 %v603_v62, 0.0 }
 0x14a   : > { %v608_v3 = vmax.f32 %v604_v0, 0.0  ;;  %v455_v4 = vadd.f32 %v447_v1, %v380_v61 }
 0x14b   : > { %661 = vst.msk [vmem:[%s1143_s15] sm:$0xff] %vm619_vm2, %v607_v2  ;;  %820 = vmatmul.msk.f32.vlgmr.msrb.gmra.mxu2 %vm619_vm2, %v607_v2 }
 0x14c   : > { %664 = vrot.lane.b32.xlu0 %v608_v3, %s964_s13  ;;  %663 = vst.msk [vmem:[%s1143_s15 + $0x8] sm:$0x7f] %vm662_vm3, %v608_v3  ;;  %v530_v7 = vadd.f32 %v522_v44, %v455_v4 }
 0x14f   : > { %v375_v6 = vpop.f32.mrf.mxu2  ;;  %v597_v9 = vpop.f32.mrf.mxu1 }
 0x150   : > { %v381_v8 = vadd.f32 %v375_v6, %v305_v5  ;;  %v605_v10 = vadd.f32 %v597_v9, %v530_v7 }
 0x151   : > { %v450_v11 = vpop.f32.mrf.mxu3 }
 0x152   : > { %v609_v12 = vmax.f32 %v605_v10, 0.0  ;;  %v456_v13 = vadd.f32 %v450_v11, %v381_v8 }
 0x153   : > { %821 = vmatmul.msk.f32.gmra.mxu2 %vm619_vm2, %v608_v3 }
 0x154   : > { %666 = vrot.lane.b32.xlu1 %v609_v12, %s964_s13  ;;  %v531_v14 = vadd.f32 %v525_v50, %v456_v13 }
 0x157   : > { %v600_v15 = vpop.f32.mrf.mxu1 }
 0x158   : > { %v606_v16 = vadd.f32 %v600_v15, %v531_v14 }
 0x15a   : > { %v610_v17 = vmax.f32 %v606_v16, 0.0 }
 0x15b   : > { %822 = vmatmul.msk.f32.gmra.mxu2 %vm619_vm2, %v609_v12 }
 0x15c   : > { %823 = vmatmul.msk.f32.vlgmr.msra.gmra.mxu3 %vm619_vm2, %v610_v17 }
 0x1be   : > { %v665_v18 = vpop.permute.xlu0 %664 }
 0x1bf   : > { %674 = vst.msk [vmem:[%s1143_s15 - $0x7] sm:$0x80] %vm673_vm4, %v665_v18 }
 0x1c6   : > { %v667_v19 = vpop.permute.xlu1 %666 }
 0x1c7   : > { %676 = vst.msk [vmem:[%s1143_s15 + $0x1] sm:$0xff] %vm675_vm5, %v667_v19 }
 0x1ce   : > { %v649_v20 = vpop.f32.mrf.mxu2 }
 0x1cf   : > { %824 = vst.msk [vmem:[%s1143_s15 + $0x10] sm:$0xff] %vm619_vm2, %v649_v20  ;;  %698 = vrot.lane.b32.xlu2 %v649_v20, %s964_s13 }
 0x1d6   : > { %v652_v21 = vpop.f32.mrf.mxu2 }
 0x1d7   : > { %825 = vst.msk [vmem:[%s1143_s15 + $0x18] sm:$0x7f] %vm662_vm3, %v652_v21  ;;  %668 = vrot.lane.b32.xlu2 %v610_v17, %s964_s13  ;;  %685 = vrot.lane.b32.xlu1 %v652_v21, %s964_s13 }
 0x1de   : > { %v655_v22 = vpop.f32.mrf.mxu2 }
 0x1df   : > { %v658_v23 = vpop.f32.mrf.mxu3  ;;  %687 = vrot.lane.b32.xlu0 %v655_v22, %s964_s13 }
 0x1e0   : > { %689 = vrot.lane.b32.xlu1 %v658_v23, %s964_s13 }
 0x229   : > { %v699_v24 = vpop.permute.xlu2 %698 }
 0x22a   : > { %829 = vst.msk [vmem:[%s1143_s15 + $0x20] sm:$0xff] %vm619_vm2, %v699_v24 }
 0x22b   : > { %831 = vst.msk [vmem:[%s1143_s15 + $0x19] sm:$0x80] %vm673_vm4, %v652_v21 }
 0x231   : > { %v669_v25 = vpop.permute.xlu2 %668 }
 0x232   : > { %678 = vst.msk [vmem:[%s1143_s15 + $0x9] sm:$0x3f] %vm677_vm6, %v669_v25 }
 0x249   : > { %v686_v26 = vpop.permute.xlu1 %685 }
 0x24a   : > { %826 = vst.msk [vmem:[%s1143_s15 + $0x9] sm:$0x80] %vm673_vm4, %v686_v26 }
 0x24b   : > { %830 = vst.msk [vmem:[%s1143_s15 + $0x28] sm:$0x7f] %vm662_vm3, %v686_v26 }
 0x24c   : > { %832 = vst.msk [vmem:[%s1143_s15 + $0x21] sm:$0xff] %vm675_vm5, %v655_v22 }
 0x24d   : > { %833 = vst.msk [vmem:[%s1143_s15 + $0x29] sm:$0x3f] %vm677_vm6, %v658_v23 }
 0x251   : > { %v688_v27 = vpop.permute.xlu0 %687 }
 0x252   : > { %v690_v28 = vpop.permute.xlu1 %689  ;;  %827 = vst.msk [vmem:[%s1143_s15 + $0x11] sm:$0xff] %vm675_vm5, %v688_v27 }
 0x253   : > { %828 = vst.msk [vmem:[%s1143_s15 + $0x19] sm:$0x3f] %vm677_vm6, %v690_v28 }
 0x254 PF: > { %s13_s12 = sadd.s32 1, %s957_s12  }
 0x255   : > { %p10_p4 = scmp.ge.s32.totalorder %s13_s12, 4  }
 0x257   :  { %12 = sbr.rel (!%p10_p4) target bundleno = 1 (0x1), region = 69 }

</bundles_post_ra>
